<compile_context>
chip_gen: v6e
topology: v6e:2x2x1
jax: 0.10.0
libtpu: 0.0.40
codegen_flags: <defaults>
</compile_context>

<pallas_src>
import jax
import jax.numpy as jnp
from jax import lax
from jax.experimental import pallas as pl
from jax.experimental.pallas import tpu as pltpu


# ----------------------------- kernel ------------------------------------- #

def _roll_left(a, s):
    """Shift a (C, N) slab left by static `s` lanes, wrapping the tail."""
    if s == 0:
        return a
    return jnp.concatenate([a[:, s:], a[:, :s]], axis=1)


def tdnn_kernel(x_ref, w1_ref, b1_ref, w2_ref, b2_ref, w3_ref, b3_ref, o_ref):
    """One grid step = one batch tile, batch folded into the lane dimension.

    x_ref : (1, N)  f32   N = Bt * W, W = round_up(L, 128)
    w1_ref: (4, 2),  b1_ref: (4, 1)     layer 1 (Conv1d 1->4,  K=2, d=1)
    w2_ref: (8, 16), b2_ref: (8, 1)     layer 2 im2col (Conv1d 4->8,  K=4, d=2)
    w3_ref: (16,64), b3_ref: (16, 1)    layer 3 im2col (Conv1d 8->16, K=8, d=4)
    o_ref : (16, N) f32   lane-dense; wrapper keeps the first L-35 cols/segment
    """
    x = x_ref[...]                                     # (1, N)
    n = x.shape[1]

    # ---- layer 1: single broadcasted VPU MAC on a (4, N) slab --------------
    x0 = jnp.broadcast_to(x, (4, n))
    x1 = jnp.broadcast_to(_roll_left(x, 1), (4, n))
    w1 = w1_ref[...]                                   # (4, 2)
    h1 = jnp.maximum(w1[:, 0:1] * x0 + w1[:, 1:2] * x1 + b1_ref[...], 0.0)

    # ---- layer 2: im2col rows ordered k*4 + c_in -> ONE matmul -------------
    s2 = jnp.concatenate([_roll_left(h1, 2 * k) for k in range(4)], axis=0)
    h2 = jnp.maximum(
        jnp.dot(w2_ref[...], s2, preferred_element_type=jnp.float32)
        + b2_ref[...], 0.0)                            # (8, N)

    # ---- layer 3: im2col rows ordered k*8 + c_in -> ONE matmul -------------
    s3 = jnp.concatenate([_roll_left(h2, 4 * k) for k in range(8)], axis=0)
    h3 = jnp.maximum(
        jnp.dot(w3_ref[...], s3, preferred_element_type=jnp.float32)
        + b3_ref[...], 0.0)                            # (16, N)

    # full, unmasked, lane-dense store
    o_ref[...] = h3.astype(o_ref.dtype)


# ----------------------------- wrapper ------------------------------------ #

def _pick_batch_tile(B):
    """Largest divisor of B that still leaves a grid of >= 2 steps (cap 8)."""
    if B <= 1:
        return 1
    cap = min(8, B // 2)
    return max(d for d in range(1, cap + 1) if B % d == 0)


def tdnn_forward(x, params):
    """x: (B, 1, L) float32. Returns (B, 16, L - 35) float32."""
    (w1, b1), (w2, b2), (w3, b3) = params
    B, C_in, L = x.shape
    assert C_in == 1
    L3 = L - 35
    assert L3 >= 1, "input too short for the TDNN receptive field (needs L >= 36)"

    # Common lane-aligned per-element segment width; W >= L >= L3 + 35.
    W = ((L + 127) // 128) * 128
    Bt = _pick_batch_tile(B)
    grid = B // Bt
    N = Bt * W

    # Flatten batch into the lane dimension: (1, B*W), zero pad per segment.
    x2d = jnp.pad(x.reshape(B, L).astype(jnp.float32), ((0, 0), (0, W - L)))
    x_flat = x2d.reshape(1, B * W)

    # Layer-1 params as tiny VMEM tiles (broadcast inside the kernel).
    w1_m = w1.reshape(4, 2).astype(jnp.float32)
    b1_c = b1.reshape(4, 1).astype(jnp.float32)
    # Layers 2/3: im2col weights (C_out, K*C_in); column index = k*C_in + c_in.
    w2_m = jnp.transpose(w2, (0, 2, 1)).reshape(8, 16).astype(jnp.float32)
    b2_c = b2.reshape(8, 1).astype(jnp.float32)
    w3_m = jnp.transpose(w3, (0, 2, 1)).reshape(16, 64).astype(jnp.float32)
    b3_c = b3.reshape(16, 1).astype(jnp.float32)

    const = lambda a: pl.BlockSpec(a.shape, lambda i: (0, 0))

    out = pl.pallas_call(
        tdnn_kernel,
        out_shape=jax.ShapeDtypeStruct((16, B * W), jnp.float32),
        grid_spec=pltpu.PrefetchScalarGridSpec(
            num_scalar_prefetch=0,
            grid=(grid,),
            in_specs=[
                pl.BlockSpec((1, N), lambda i: (0, i)),          # x batch tile
                const(w1_m), const(b1_c),
                const(w2_m), const(b2_c),
                const(w3_m), const(b3_c),
            ],
            out_specs=pl.BlockSpec((16, N), lambda i: (0, i)),
        ),
        compiler_params=pltpu.CompilerParams(
            dimension_semantics=("parallel",)),
    )(x_flat, w1_m, b1_c, w2_m, b2_c, w3_m, b3_c)

    # (16, B*W) -> (B, 16, L3): drop per-segment padding, restore batch-major.
    return jnp.transpose(out.reshape(16, B, W)[:, :, :L3], (1, 0, 2))


# ----------------------------- reference ---------------------------------- #

def tdnn_reference(x, params):
    """Pure-JAX reference using lax.conv_general_dilated (matches PyTorch)."""
    h = x
    for (w, b), d in zip(params, (1, 2, 4)):
        h = lax.conv_general_dilated(
            h, w, window_strides=(1,), padding="VALID", rhs_dilation=(d,),
            dimension_numbers=("NCH", "OIH", "NCH"),
            precision=lax.Precision.HIGHEST)
        h = jnp.maximum(h + b.reshape(1, -1, 1), 0.0)
    return h


def init_params(key):
    """Deterministic Conv1d params (PyTorch-style uniform fan-in init)."""
    shapes = [((4, 1, 2), (4,)), ((8, 4, 4), (8,)), ((16, 8, 8), (16,))]
    params = []
    for (wshape, bshape) in shapes:
        key, kw, kb = jax.random.split(key, 3)
        fan_in = wshape[1] * wshape[2]
        bound = 1.0 / jnp.sqrt(fan_in)
        w = jax.random.uniform(kw, wshape, jnp.float32, -bound, bound)
        b = jax.random.uniform(kb, bshape, jnp.float32, -bound, bound)
        params.append((w, b))
    return params


# ------------------------------- main -------------------------------------- #

if __name__ == "__main__":
    key = jax.random.PRNGKey(0)
    kx, kp = jax.random.split(key)

    B, L = 2, 128                       # input: (batch=2, channels=1, length=128)
    x = jax.random.normal(kx, (B, 1, L), jnp.float32)
    params = init_params(kp)

    out = tdnn_forward(x, params)
    out = jax.block_until_ready(out)

    ref = tdnn_reference(x, params)
    assert out.shape == ref.shape == (B, 16, L - 35), (out.shape, ref.shape)
    max_err = float(jnp.max(jnp.abs(out - ref)))
    assert jnp.allclose(out, ref, atol=1e-4, rtol=1e-4), max_err

    print("KERNEL_OK")
</pallas_src>

<mosaic_0001>
module attributes {stable_mosaic.version = 11 : i64} {
  func.func @tdnn_kernel(%arg0: i32, %arg1: memref<1x128xf32, #tpu.memory_space<vmem>>, %arg2: memref<4x2xf32, #tpu.memory_space<vmem>>, %arg3: memref<4x1xf32, #tpu.memory_space<vmem>>, %arg4: memref<8x16xf32, #tpu.memory_space<vmem>>, %arg5: memref<8x1xf32, #tpu.memory_space<vmem>>, %arg6: memref<16x64xf32, #tpu.memory_space<vmem>>, %arg7: memref<16x1xf32, #tpu.memory_space<vmem>>, %arg8: memref<16x128xf32, #tpu.memory_space<vmem>>) attributes {dimension_semantics = [#tpu.dimension_semantics<parallel>], iteration_bounds = array<i64: 2>, scalar_prefetch = 0 : i64, scratch_operands = 0 : i64, tpu.core_type = #tpu.core_type<tc>, window_params = [{transform_indices = @transform_0, window_bounds = array<i64: 1, 128>}, {pipeline_mode = #tpu.pipeline_mode<synchronous>, transform_indices = @transform_1, window_bounds = array<i64: 4, 2>}, {pipeline_mode = #tpu.pipeline_mode<synchronous>, transform_indices = @transform_2, window_bounds = array<i64: 4, 1>}, {pipeline_mode = #tpu.pipeline_mode<synchronous>, transform_indices = @transform_3, window_bounds = array<i64: 8, 16>}, {pipeline_mode = #tpu.pipeline_mode<synchronous>, transform_indices = @transform_4, window_bounds = array<i64: 8, 1>}, {pipeline_mode = #tpu.pipeline_mode<synchronous>, transform_indices = @transform_5, window_bounds = array<i64: 16, 64>}, {pipeline_mode = #tpu.pipeline_mode<synchronous>, transform_indices = @transform_6, window_bounds = array<i64: 16, 1>}, {transform_indices = @transform_7, window_bounds = array<i64: 16, 128>}]} {
    %c0 = arith.constant 0 : index
    %c0_0 = arith.constant 0 : index
    %0 = vector.load %arg1[%c0, %c0_0] : memref<1x128xf32, #tpu.memory_space<vmem>>, vector<1x128xf32>
    %1 = vector.shape_cast %0 : vector<1x128xf32> to vector<1x128xf32>
    %2 = vector.broadcast %1 : vector<1x128xf32> to vector<4x128xf32>
    %3 = vector.extract_strided_slice %0 {offsets = [0, 1], sizes = [1, 127], strides = [1, 1]} : vector<1x128xf32> to vector<1x127xf32>
    %4 = vector.extract_strided_slice %0 {offsets = [0, 0], sizes = [1, 1], strides = [1, 1]} : vector<1x128xf32> to vector<1x1xf32>
    %5 = tpu.concatenate %3, %4 in 1 : vector<1x127xf32>, vector<1x1xf32> -> vector<1x128xf32>
    %6 = vector.shape_cast %5 : vector<1x128xf32> to vector<1x128xf32>
    %7 = vector.broadcast %6 : vector<1x128xf32> to vector<4x128xf32>
    %c0_1 = arith.constant 0 : index
    %c0_2 = arith.constant 0 : index
    %8 = vector.load %arg2[%c0_1, %c0_2] : memref<4x2xf32, #tpu.memory_space<vmem>>, vector<4x2xf32>
    %9 = vector.extract_strided_slice %8 {offsets = [0, 0], sizes = [4, 1], strides = [1, 1]} : vector<4x2xf32> to vector<4x1xf32>
    %10 = vector.broadcast %9 : vector<4x1xf32> to vector<4x128xf32>
    %11 = arith.mulf %10, %2 : vector<4x128xf32>
    %12 = vector.extract_strided_slice %8 {offsets = [0, 1], sizes = [4, 1], strides = [1, 1]} : vector<4x2xf32> to vector<4x1xf32>
    %13 = vector.broadcast %12 : vector<4x1xf32> to vector<4x128xf32>
    %14 = arith.mulf %13, %7 : vector<4x128xf32>
    %15 = arith.addf %11, %14 : vector<4x128xf32>
    %c0_3 = arith.constant 0 : index
    %c0_4 = arith.constant 0 : index
    %16 = vector.load %arg3[%c0_3, %c0_4] : memref<4x1xf32, #tpu.memory_space<vmem>>, vector<4x1xf32>
    %17 = vector.broadcast %16 : vector<4x1xf32> to vector<4x128xf32>
    %18 = arith.addf %15, %17 : vector<4x128xf32>
    %cst = arith.constant 0.000000e+00 : f32
    %19 = vector.broadcast %cst : f32 to vector<4x128xf32>
    %20 = arith.maximumf %18, %19 : vector<4x128xf32>
    %21 = vector.extract_strided_slice %20 {offsets = [0, 2], sizes = [4, 126], strides = [1, 1]} : vector<4x128xf32> to vector<4x126xf32>
    %22 = vector.extract_strided_slice %20 {offsets = [0, 0], sizes = [4, 2], strides = [1, 1]} : vector<4x128xf32> to vector<4x2xf32>
    %23 = tpu.concatenate %21, %22 in 1 : vector<4x126xf32>, vector<4x2xf32> -> vector<4x128xf32>
    %24 = vector.extract_strided_slice %20 {offsets = [0, 4], sizes = [4, 124], strides = [1, 1]} : vector<4x128xf32> to vector<4x124xf32>
    %25 = vector.extract_strided_slice %20 {offsets = [0, 0], sizes = [4, 4], strides = [1, 1]} : vector<4x128xf32> to vector<4x4xf32>
    %26 = tpu.concatenate %24, %25 in 1 : vector<4x124xf32>, vector<4x4xf32> -> vector<4x128xf32>
    %27 = vector.extract_strided_slice %20 {offsets = [0, 6], sizes = [4, 122], strides = [1, 1]} : vector<4x128xf32> to vector<4x122xf32>
    %28 = vector.extract_strided_slice %20 {offsets = [0, 0], sizes = [4, 6], strides = [1, 1]} : vector<4x128xf32> to vector<4x6xf32>
    %29 = tpu.concatenate %27, %28 in 1 : vector<4x122xf32>, vector<4x6xf32> -> vector<4x128xf32>
    %30 = tpu.concatenate %20, %23, %26, %29 in 0 : vector<4x128xf32>, vector<4x128xf32>, vector<4x128xf32>, vector<4x128xf32> -> vector<16x128xf32>
    %c0_5 = arith.constant 0 : index
    %c0_6 = arith.constant 0 : index
    %31 = vector.load %arg4[%c0_5, %c0_6] : memref<8x16xf32, #tpu.memory_space<vmem>>, vector<8x16xf32>
    %cst_7 = arith.constant dense<0.000000e+00> : vector<8x128xf32>
    %32 = tpu.matmul %31, %30, %cst_7 {dimension_numbers = #tpu.dot_dimension_numbers<[1], [0], [0], [1], [0, 0, 1, 1], [], []>} : vector<8x16xf32>, vector<16x128xf32>, vector<8x128xf32> -> vector<8x128xf32>
    %c0_8 = arith.constant 0 : index
    %c0_9 = arith.constant 0 : index
    %33 = vector.load %arg5[%c0_8, %c0_9] : memref<8x1xf32, #tpu.memory_space<vmem>>, vector<8x1xf32>
    %34 = vector.broadcast %33 : vector<8x1xf32> to vector<8x128xf32>
    %35 = arith.addf %32, %34 : vector<8x128xf32>
    %cst_10 = arith.constant 0.000000e+00 : f32
    %36 = vector.broadcast %cst_10 : f32 to vector<8x128xf32>
    %37 = arith.maximumf %35, %36 : vector<8x128xf32>
    %38 = vector.extract_strided_slice %37 {offsets = [0, 4], sizes = [8, 124], strides = [1, 1]} : vector<8x128xf32> to vector<8x124xf32>
    %39 = vector.extract_strided_slice %37 {offsets = [0, 0], sizes = [8, 4], strides = [1, 1]} : vector<8x128xf32> to vector<8x4xf32>
    %40 = tpu.concatenate %38, %39 in 1 : vector<8x124xf32>, vector<8x4xf32> -> vector<8x128xf32>
    %41 = vector.extract_strided_slice %37 {offsets = [0, 8], sizes = [8, 120], strides = [1, 1]} : vector<8x128xf32> to vector<8x120xf32>
    %42 = vector.extract_strided_slice %37 {offsets = [0, 0], sizes = [8, 8], strides = [1, 1]} : vector<8x128xf32> to vector<8x8xf32>
    %43 = tpu.concatenate %41, %42 in 1 : vector<8x120xf32>, vector<8x8xf32> -> vector<8x128xf32>
    %44 = vector.extract_strided_slice %37 {offsets = [0, 12], sizes = [8, 116], strides = [1, 1]} : vector<8x128xf32> to vector<8x116xf32>
    %45 = vector.extract_strided_slice %37 {offsets = [0, 0], sizes = [8, 12], strides = [1, 1]} : vector<8x128xf32> to vector<8x12xf32>
    %46 = tpu.concatenate %44, %45 in 1 : vector<8x116xf32>, vector<8x12xf32> -> vector<8x128xf32>
    %47 = vector.extract_strided_slice %37 {offsets = [0, 16], sizes = [8, 112], strides = [1, 1]} : vector<8x128xf32> to vector<8x112xf32>
    %48 = vector.extract_strided_slice %37 {offsets = [0, 0], sizes = [8, 16], strides = [1, 1]} : vector<8x128xf32> to vector<8x16xf32>
    %49 = tpu.concatenate %47, %48 in 1 : vector<8x112xf32>, vector<8x16xf32> -> vector<8x128xf32>
    %50 = vector.extract_strided_slice %37 {offsets = [0, 20], sizes = [8, 108], strides = [1, 1]} : vector<8x128xf32> to vector<8x108xf32>
    %51 = vector.extract_strided_slice %37 {offsets = [0, 0], sizes = [8, 20], strides = [1, 1]} : vector<8x128xf32> to vector<8x20xf32>
    %52 = tpu.concatenate %50, %51 in 1 : vector<8x108xf32>, vector<8x20xf32> -> vector<8x128xf32>
    %53 = vector.extract_strided_slice %37 {offsets = [0, 24], sizes = [8, 104], strides = [1, 1]} : vector<8x128xf32> to vector<8x104xf32>
    %54 = vector.extract_strided_slice %37 {offsets = [0, 0], sizes = [8, 24], strides = [1, 1]} : vector<8x128xf32> to vector<8x24xf32>
    %55 = tpu.concatenate %53, %54 in 1 : vector<8x104xf32>, vector<8x24xf32> -> vector<8x128xf32>
    %56 = vector.extract_strided_slice %37 {offsets = [0, 28], sizes = [8, 100], strides = [1, 1]} : vector<8x128xf32> to vector<8x100xf32>
    %57 = vector.extract_strided_slice %37 {offsets = [0, 0], sizes = [8, 28], strides = [1, 1]} : vector<8x128xf32> to vector<8x28xf32>
    %58 = tpu.concatenate %56, %57 in 1 : vector<8x100xf32>, vector<8x28xf32> -> vector<8x128xf32>
    %59 = tpu.concatenate %37, %40, %43, %46, %49, %52, %55, %58 in 0 : vector<8x128xf32>, vector<8x128xf32>, vector<8x128xf32>, vector<8x128xf32>, vector<8x128xf32>, vector<8x128xf32>, vector<8x128xf32>, vector<8x128xf32> -> vector<64x128xf32>
    %c0_11 = arith.constant 0 : index
    %c0_12 = arith.constant 0 : index
    %60 = vector.load %arg6[%c0_11, %c0_12] : memref<16x64xf32, #tpu.memory_space<vmem>>, vector<16x64xf32>
    %cst_13 = arith.constant dense<0.000000e+00> : vector<16x128xf32>
    %61 = tpu.matmul %60, %59, %cst_13 {dimension_numbers = #tpu.dot_dimension_numbers<[1], [0], [0], [1], [0, 0, 1, 1], [], []>} : vector<16x64xf32>, vector<64x128xf32>, vector<16x128xf32> -> vector<16x128xf32>
    %c0_14 = arith.constant 0 : index
    %c0_15 = arith.constant 0 : index
    %62 = vector.load %arg7[%c0_14, %c0_15] : memref<16x1xf32, #tpu.memory_space<vmem>>, vector<16x1xf32>
    %63 = vector.broadcast %62 : vector<16x1xf32> to vector<16x128xf32>
    %64 = arith.addf %61, %63 : vector<16x128xf32>
    %cst_16 = arith.constant 0.000000e+00 : f32
    %65 = vector.broadcast %cst_16 : f32 to vector<16x128xf32>
    %66 = arith.maximumf %64, %65 : vector<16x128xf32>
    %c0_17 = arith.constant 0 : index
    %c0_18 = arith.constant 0 : index
    %67 = vector.load %arg8[%c0_17, %c0_18] : memref<16x128xf32, #tpu.memory_space<vmem>>, vector<16x128xf32>
    tpu.vector_store %arg8[%c0_17, %c0_18], %66 {strides = array<i32>} : memref<16x128xf32, #tpu.memory_space<vmem>>, vector<16x128xf32>,
    return
  }
  func.func @transform_0(%arg0: i32) -> (i32, i32) {
    %c0_i32 = arith.constant 0 : i32
    %c0_i32_0 = arith.constant 0 : i32
    return %c0_i32, %arg0 : i32, i32
  }
  func.func @transform_1(%arg0: i32) -> (i32, i32) {
    %c0_i32 = arith.constant 0 : i32
    %c0_i32_0 = arith.constant 0 : i32
    %c0_i32_1 = arith.constant 0 : i32
    return %c0_i32, %c0_i32_0 : i32, i32
  }
  func.func @transform_2(%arg0: i32) -> (i32, i32) {
    %c0_i32 = arith.constant 0 : i32
    %c0_i32_0 = arith.constant 0 : i32
    %c0_i32_1 = arith.constant 0 : i32
    return %c0_i32, %c0_i32_0 : i32, i32
  }
  func.func @transform_3(%arg0: i32) -> (i32, i32) {
    %c0_i32 = arith.constant 0 : i32
    %c0_i32_0 = arith.constant 0 : i32
    %c0_i32_1 = arith.constant 0 : i32
    return %c0_i32, %c0_i32_0 : i32, i32
  }
  func.func @transform_4(%arg0: i32) -> (i32, i32) {
    %c0_i32 = arith.constant 0 : i32
    %c0_i32_0 = arith.constant 0 : i32
    %c0_i32_1 = arith.constant 0 : i32
    return %c0_i32, %c0_i32_0 : i32, i32
  }
  func.func @transform_5(%arg0: i32) -> (i32, i32) {
    %c0_i32 = arith.constant 0 : i32
    %c0_i32_0 = arith.constant 0 : i32
    %c0_i32_1 = arith.constant 0 : i32
    return %c0_i32, %c0_i32_0 : i32, i32
  }
  func.func @transform_6(%arg0: i32) -> (i32, i32) {
    %c0_i32 = arith.constant 0 : i32
    %c0_i32_0 = arith.constant 0 : i32
    %c0_i32_1 = arith.constant 0 : i32
    return %c0_i32, %c0_i32_0 : i32, i32
  }
  func.func @transform_7(%arg0: i32) -> (i32, i32) {
    %c0_i32 = arith.constant 0 : i32
    %c0_i32_0 = arith.constant 0 : i32
    return %c0_i32, %arg0 : i32, i32
  }
}

</mosaic_0001>

<bundles_post_ra>
// kernel: tpu_custom_call.1
= control target key start
LH: loop header
LB: loop body
LE: loop exit
PB: predicated region body
PF: predicated region fallthrough
CT: control target
= control target key end

     0   :  { %12 = vsyncpa [#allocation3], 0  ;;  %s963_s0 = inlined_call_operand.vmem [shape: f32[1,256], index: 0, kind: input, shape index: {}]   ;;  %s964_s1 = inlined_call_operand.vmem [shape: f32[4,2], index: 1, kind: input, shape index: {}]   ;;  %s965_s2 = inlined_call_operand.vmem [shape: f32[4,1], index: 2, kind: input, shape index: {}]   ;;  %s966_s3 = inlined_call_operand.vmem [shape: f32[8,16], index: 3, kind: input, shape index: {}]   ;;  %s967_s4 = inlined_call_operand.vmem [shape: f32[8,1], index: 4, kind: input, shape index: {}]   ;;  %s968_s5 = inlined_call_operand.vmem [shape: f32[16,64], index: 5, kind: input, shape index: {}]   ;;  %s969_s6 = inlined_call_operand.vmem [shape: f32[16,1], index: 6, kind: input, shape index: {}]   ;;  %s970_s7 = inlined_call_operand.hbm [shape: f32[16,256], index: 7, kind: output, shape index: {}]  }
   0x1   :  { %14 = vsyncpa [#allocation3 + $0x1], 0  ;;  %s833_s24 = smov 0   ;;  %s835_s25 = smov 0  }
   0x2   :  { %s837_s26 = smov 0   ;;  %s839_s27 = smov 0  }
   0x3 LB: > { %s854_s28 = sadd.s32 4294967295, %s773_s27   ;;  %s601_s29 = sadd.s32 4294967294, %s773_s27   ;;  %s773_s27 = sphi %s839_s27, %s976_s27   ;;  %s769_s26 = sphi %s837_s26, %s975_s26   ;;  %s765_s25 = sphi %s835_s25, %s974_s25   ;;  %s761_s24 = sphi %s833_s24, %s973_s24  }
   0x4   : > { %s858_s30 = sadd.s32 1, %s773_s27   ;;  %s179_s8 = sadd.s32 1, %s769_s26 }
   0x5   : > { %s176_s9 = ssub.s32 %s773_s27, %s858_s30  ;;  %p189_p0 = scmp.ne.s32.totalorder %s769_s26, %s765_s25 }
   0x6   : > { %p177_p1 = scmp.eq.s32.totalorder %s176_s9, 0  ;;  %p190_p2 = scmp.eq.s32.totalorder %s854_s28, 1 }
   0x7   : > { %p195_p3 = scmp.ne.s32.totalorder %s765_s25, %s761_s24  ;;  %p196_p4 = scmp.eq.s32.totalorder %s601_s29, 1 }
   0x8   : > { %s869_s10 = scalar_select %p177_p1, %s769_s26, %s179_s8  }
   0x9   : > { %p871_p5 = por %p190_p2, %p189_p0  ;;  %p875_p6 = por %p196_p4, %p195_p3 }
   0xa   : > { %p604_p7 = scmp.ge.s32.totalorder %s773_s27, 1  ;;  %p238_p8 = scmp.lt.s32.totalorder %s773_s27, 3 }
   0xc   : > { %p239_p9 = pnand %p604_p7, %p238_p8 }
   0xd   : > { %p268_p10 = scmp.lt.s32.totalorder (!%p239_p9), %s854_s28, 1  ;;  %s777_s19 = smov (!%p239_p9), 127  }
   0xe   : > { %242 = sbr.rel (%p239_p9) target bundleno = 825 (0x339), region = 48  ;;  %s780_s22 = smov (!%p239_p9), 126  }
   0xf   : > { %s781_s23 = smov (!%p239_p9), 122   ;;  %s782_s9 = smov (!%p239_p9), 124  }
  0x10   : > { %s784_s16 = smov (!%p239_p9), 100   ;;  %s786_s20 = smov (!%p239_p9), 104  }
  0x11   : > { %s787_s21 = smov (!%p239_p9), 112   ;;  %s788_s29 = smov (!%p239_p9), 120  }
  0x13   : > { %v285_v0 = vld [vmem:[%s964_s1] sm:$0xf]  ;;  %v775_v1 = vmov 0   ;;  %s269_s15 = scalar_select %p268_p10, %s854_s28, 1  ;;  %v776_v3 = vmov 1   ;;  %v281_v5 = vlaneseq  ;;  %v778_v12 = vmov 0.0  }
  0x14   : > { %709 = vset.pattern.permute.xlu0 %v775_v1  ;;  %711 = vset.pattern.permute.xlu1 %v775_v1  ;;  %v298_v4 = vld [vmem:[%s965_s2] sm:$0xf]  ;;  %vm779_vm0 = vmmov 0   ;;  %vm322_vm1 = vcmask 1043456   ;;  %vm332_vm2 = vcmask 130048   ;;  %vm443_vm3 = vcmask 523264  }
  0x15   : > { %288 = vperm.xlu0 %709, %v285_v0   ;;  %s270_s18 = scalar_lea.vmem %s963_s0, %s269_s15  ;;  %v282_v6 = vshrl.u32 %v281_v5, 7  ;;  %627 = vmatprep.subr.mxu0 %v778_v12  ;;  %v326_v19 = vld [vmem:[%s967_s4] sm:$0xff]  ;;  %s783_s15 = smov 108   ;;  %v432_v34 = vld [vmem:[%s969_s6 + $0x8] sm:$0xff] }
  0x16   : > { %v606_v2 = vld [vmem:[%s270_s18] ss:$0 sm:$0xff]  ;;  %631 = vmatprep.mubr.msk.f32.mxu0 %vm779_vm0, %v778_v12  ;;  %v430_v43 = vld [vmem:[%s968_s5 + $0x8] sm:$0xff] }
  0x17   : > { %278 = vrot.lane.b32.xlu1 %v606_v2, %s777_s19  ;;  %v283_v7 = vsub.s32 0, %v282_v6  ;;  %v325_v26 = vld [vmem:[%s966_s3] sm:$0xff]  ;;  %s785_s19 = smov 116  }
  0x18   : > { %v429_v33 = vld [vmem:[%s968_s5] sm:$0xff] }
  0x19   : > { %710 = vset.pattern.permute.xlu0 %v776_v3  ;;  %650 = vmatprep.mubr.msk.f32.mxu1 %vm443_vm3, %v429_v33  ;;  %v431_v35 = vld [vmem:[%s969_s6] sm:$0xff] }
  0x1a   : > { %293 = vperm.xlu0 %710, %v285_v0  }
  0x1b   : > { %301 = vperm.xlu1 %711, %v298_v4  }
  0x1e   : > { %712 = vset.pattern.permute.xlu0 %v775_v1 }
  0x89   : > { %v279_v9 = vpop.permute.xlu1 %278 }
  0x8a   : > { %v284_v10 = vrot.slane %v279_v9, %v283_v7 }
  0x90   : > { %v289_v8 = vpop.permute.xlu0 %288 }
  0x91   : > { %v291_v13 = vmul.f32 %v606_v2, %v289_v8 }
  0x95   : > { %v294_v11 = vpop.permute.xlu0 %293 }
  0x96   : > { %v296_v14 = vmul.f32 %v294_v11, %v284_v10  ;;  %v302_v15 = vpop.permute.xlu1 %301 }
  0x98   : > { %v297_v16 = vadd.f32 %v296_v14, %v291_v13 }
  0x9a   : > { %v304_v17 = vadd.f32 %v302_v15, %v297_v16 }
  0x9c   : > { %v305_v18 = vmax.f32 %v304_v17, 0.0 }
  0x9e   : > { %307 = vrot.lane.b32.xlu0 %v305_v18, %s780_s22  ;;  %313 = vrot.lane.b32.xlu1 %v305_v18, %s781_s23 }
  0xa2   : > { %310 = vrot.lane.b32.xlu1 %v305_v18, %s782_s9  ;;  %329 = vperm.xlu0 %712, %v326_v19  }
 0x110   : > { %v308_v20 = vpop.permute.xlu0 %307  ;;  %v314_v21 = vpop.permute.xlu1 %313 }
 0x111   : > { %v317_v22 = vrot.slane %v308_v20, 4  ;;  %v320_v23 = vrot.slane %v314_v21, 4 }
 0x113   : > { %v323_v27 = vsel %vm322_vm1, %v305_v18, %v317_v22 }
 0x114   : > { %v311_v24 = vpop.permute.xlu1 %310 }
 0x115   : > { %v324_v25 = vsel %vm322_vm1, %v311_v24, %v320_v23 }
 0x116   : > { %628 = vmatpush3.msra.mxu0 %v324_v25 }
 0x117   : > { %629 = vmatprep.subr.mxu0 %v778_v12 }
 0x118   : > { %630 = vmatpush3.msra.mxu0 %v323_v27 }
 0x119   : > { %632 = vmatmul.mubr.msk.f32.vlgmr.msra.gmra.mxu0 %vm332_vm2, %v325_v26 }
 0x11d   : > { %v330_v28 = vpop.permute.xlu0 %329 }
 0x1d9   : > { %v402_v29 = vpop.f32.mrf.mxu0 }
 0x1da   : > { %v403_v30 = vadd.f32 %v402_v29, %v330_v28 }
 0x1db   : > { %v633_v31 = vpop.f32.mrf.mxu0 }
 0x1dc   : > { %v406_v32 = vmax.f32 %v403_v30, 0.0 }
 0x1de   : > { %420 = vrot.lane.b32.xlu0 %v406_v32, %s783_s15  ;;  %426 = vrot.lane.b32.xlu1 %v406_v32, %s784_s16  ;;  %s265_s15 = sand.u32 1, %s765_s25  }
 0x1df   : > { %s605_s16 = sshll.u32 %s265_s15, 4  ;;  %s923_s23 = scalar_lea.sflag [#allocation3], %s265_s15 }
 0x1e0   : > { %s267_s17 = scalar_lea.vmem [#allocation2], %s605_s16 }
 0x1e1   : > { %s542_s18 = sshll.u32 %s267_s17, 4  ;;  %s916_s18 = int_to_ptr.vmem [resolvable:$true] %s542_s18 }
 0x1e2   : > { %414 = vrot.lane.b32.xlu0 %v406_v32, %s785_s19  ;;  %423 = vrot.lane.b32.xlu1 %v406_v32, %s786_s20  ;;  %s611_s19 = sshll.u32 %s854_s28, 7  ;;  %s713_s28 = scalar_lea.vmem %s916_s18, 256 }
 0x1e3   : > { %s921_s22 = scalar_lea.hbm %s970_s7, %s611_s19  ;;  %p714_p11 = scmp.ne.s32.totalorder %s916_s18, %s713_s28 }
 0x1e5   : > { %p715_p12 = pnand %p714_p11, %p871_p5 }
 0x1e6   : > { %408 = vrot.lane.b32.xlu0 %v406_v32, %s782_s9  ;;  %417 = vrot.lane.b32.xlu1 %v406_v32, %s787_s21 }
 0x1e7   : > { %p716_p13 = pneg %p715_p12 }
 0x1ea   : > { %440 = vperm.xlu0 %712, %v432_v34   ;;  %411 = vrot.lane.b32.xlu1 %v406_v32, %s788_s29  ;;  %s789_s29 = smov [#allocation2]  }
 0x1eb   : > { %s717_s8 = sshll.u32 %s789_s29, 4  ;;  %s718_s8 = int_to_ptr.vmem [resolvable:$false] %s717_s8 }
 0x1ec   : > { %s719_s13 = scalar_lea.vmem %s718_s8, 512  ;;  %p720_p0 = scmp.lt.s32.totalorder %s916_s18, %s718_s8 }
 0x1ed   : > { %p721_p1 = scmp.lt.s32.totalorder %s719_s13, %s713_s28 }
 0x1ee   : > { %435 = vperm.xlu1 %711, %v431_v35  }
 0x1ef   : > { %p722_p2 = por %p721_p1, %p720_p0 }
 0x1f1   : > { %p723_p3 = pnand %p722_p2, %p716_p13 }
 0x250   : > { %v427_v36 = vpop.permute.xlu1 %426  ;;  %v421_v37 = vpop.permute.xlu0 %420 }
 0x251   : > { %634 = vmatprep.subr.mxu1 %v427_v36 }
 0x252   : > { %635 = vmatpush3.msra.mxu1 %v427_v36 }
 0x254   : > { %v424_v38 = vpop.permute.xlu1 %423  ;;  %v415_v39 = vpop.permute.xlu0 %414 }
 0x255   : > { %636 = vmatprep.subr.mxu1 %v424_v38 }
 0x256   : > { %637 = vmatpush3.msra.mxu1 %v424_v38 }
 0x257   : > { %638 = vmatprep.subr.mxu1 %v421_v37 }
 0x258   : > { %639 = vmatpush3.msra.mxu1 %v421_v37  ;;  %v418_v40 = vpop.permute.xlu1 %417  ;;  %v409_v42 = vpop.permute.xlu0 %408 }
 0x259   : > { %640 = vmatprep.subr.mxu1 %v418_v40 }
 0x25a   : > { %641 = vmatpush3.msra.mxu1 %v418_v40 }
 0x25b   : > { %642 = vmatprep.subr.mxu1 %v415_v39 }
 0x25c   : > { %643 = vmatpush3.msra.mxu1 %v415_v39  ;;  %v412_v41 = vpop.permute.xlu1 %411 }
 0x25d   : > { %644 = vmatprep.subr.mxu1 %v412_v41 }
 0x25e   : > { %645 = vmatpush3.msra.mxu1 %v412_v41 }
 0x25f   : > { %646 = vmatprep.subr.mxu1 %v409_v42 }
 0x260   : > { %647 = vmatpush3.msra.mxu1 %v409_v42 }
 0x261   : > { %648 = vmatprep.subr.mxu1 %v406_v32 }
 0x262   : > { %649 = vmatpush3.msra.mxu1 %v406_v32 }
 0x263   : > { %651 = vmatmul.mubr.msk.f32.vlgmr.msra.gmra.mxu1 %vm443_vm3, %v430_v43 }
 0x265   : > { %v441_v44 = vpop.permute.xlu0 %440 }
 0x269   : > { %v436_v47 = vpop.permute.xlu1 %435 }
 0x323   : > { %v652_v45 = vpop.f32.mrf.mxu1 }
 0x324   : > { %v522_v46 = vadd.f32 %v652_v45, %v441_v44 }
 0x325   : > { %v516_v48 = vpop.f32.mrf.mxu1 }
 0x326   : > { %v526_v49 = vmax.f32 %v522_v46, 0.0  ;;  %v517_v50 = vadd.f32 %v516_v48, %v436_v47 }
 0x328   : > { %528 = vst [vmem:[%s267_s17 + $0x8] sm:$0xff] %v526_v49  ;;  %v525_v51 = vmax.f32 %v517_v50, 0.0 }
 0x32a   : > { %527 = vst [vmem:[%s267_s17] sm:$0xff] %v525_v51 }
 0x32b   : > { %726 = shalt.err (!%p723_p3)
}
 0x32c   : > { %s727_s9 = scalar_lea.hbm %s921_s22, 256  ;;  %s731_s16 = scalar_lea.hbm %s970_s7, 512 }
 0x32d   : > { %p728_p4 = scmp.ne.s32.totalorder %s921_s22, %s727_s9  ;;  %p732_p9 = scmp.lt.s32.totalorder %s921_s22, %s970_s7 }
 0x32e   : > { %p733_p10 = scmp.lt.s32.totalorder %s731_s16, %s727_s9 }
 0x32f   : > { %p729_p7 = pnand %p728_p4, %p871_p5 }
 0x330   : > { %p734_p11 = por %p733_p10, %p732_p9 }
 0x331   : > { %p730_p8 = pneg %p729_p7 }
 0x333   : > { %p735_p12 = pnand %p734_p11, %p730_p8 }
 0x335   : > { %738 = shalt.err (!%p735_p12)
}
 0x336   : > { %s790_s20 = smov 128   ;;  %s791_s21 = smov 256  }
 0x337   : > { %s792_s28 = smov 8  }
 0x338   : > { %653 = dma.vmem_to_hbm [thread:$0]  (%p871_p5), %s916_s18, 256, %s921_s22, %s923_s23, %s790_s20, %s791_s21, %s792_s28  }
 0x339 PF: > { %p659_p13 = scmp.ge.s32.totalorder %s773_s27, 2  ;;  %s557_s29 = sand.u32 1, %s761_s24  }
 0x33a   : > { %s558_s8 = scalar_lea.sflag [#allocation3], %s557_s29 }
 0x33b   : > { %p656_p0 = pnand %p659_p13, %p875_p6 }
 0x33d   : > { %p657_p1 = pneg %p656_p0 }
 0x33f   : > { %756 = dma.done.wait (%p657_p1), %s558_s8, 256  }
 0x340   : > { %758 = vsyncadd (%p657_p1), %s558_s8, 4294967040  ;;  %p17_p2 = scmp.ge.s32.totalorder %s858_s30, 4   ;;  %s973_s24 = smov %s765_s25 }
 0x341   : > { %s974_s25 = smov %s769_s26  ;;  %s975_s26 = smov %s869_s10 }
 0x342   : > { %s976_s27 = smov %s858_s30  ;;  %19 = sbr.rel (!%p17_p2) target bundleno = 3 (0x3), region = 83 }
 0x347   :  { %563 = vsyncpa [#allocation3], 1 }
 0x348   :  { %565 = vsyncpa [#allocation3 + $0x1], 1 }

</bundles_post_ra>
